<compile_context>
chip_gen: v6e
topology: v6e:2x2x1
jax: 0.10.0
libtpu: 0.0.40
codegen_flags: <defaults>
</compile_context>

<pallas_src>
import jax
import jax.numpy as jnp
from jax import lax
from jax.experimental import pallas as pl
from jax.experimental.pallas import tpu as pltpu


def linear_flow_kernel(w_ref, bias_ref, x_ref, y_ref):
    """w_ref: (1, D*D); bias_ref: (1, T) f32; x_ref: (BB, D*D, T); y_ref: (BB, 1, T) f32."""
    bb = x_ref.shape[0]                       # static (block shape)
    w = w_ref[...]                            # (1, D*D), batch-invariant, loaded once
    bias = bias_ref[...]                      # (1, T) f32

    def per_batch(b):
        # (1, D*D) @ (D*D, T) on the MXU, f32 accumulation; bias added in f32.
        acc = jnp.dot(w, x_ref[b], preferred_element_type=jnp.float32)   # (1, T)
        y_ref[b] = (acc + bias).astype(y_ref.dtype)

    if bb <= 8:
        for b in range(bb):                   # short static trip-count: unroll
            per_batch(b)
    else:
        def body(b, carry):
            per_batch(b)
            return carry
        lax.fori_loop(0, bb, body, 0)


def linear_flow_forward(x, p, l_tri, u_tri, s_sign, log_abs_s, bias,
                        *, compute_dtype=jnp.bfloat16, batch_block=None):
    B, DD, T = x.shape
    D = p.shape[0]
    assert DD == D * D and T == D, "forward requires x of shape (B, D*D, D) (bias broadcast)"

    f32 = jnp.float32

    # --- reconstruct_matrices + w = P @ L @ U in the wrapper (f32, ~1 KB, batch-invariant) ---
    eye = jnp.eye(D, dtype=f32)
    l_mask = jnp.tril(jnp.ones((D, D), f32), -1)
    u_mask = l_mask.T
    L = l_tri.astype(f32) * l_mask + eye
    U = u_tri.astype(f32) * u_mask + jnp.diag(s_sign.astype(f32) * jnp.exp(log_abs_s.astype(f32)))
    w_flat = (p.astype(f32) @ L @ U).reshape(1, DD)            # row-major flatten, f32

    # --- log_det = x.shape[2] * sum(log_abs_s): parameter-only scalar, no kernel traffic ---
    log_det = jnp.float32(T) * jnp.sum(log_abs_s.astype(f32))

    # --- low-precision DMA/MXU operands (f32 accumulation inside the kernel) ---
    x_c = x.astype(compute_dtype)
    w_c = w_flat.astype(compute_dtype)
    bias_f = bias.astype(f32).reshape(1, T)

    # --- batch-chunk grid: ~8 MiB x blocks (x2 double-buffered) stays well inside the
    #     explicit 32 MiB scoped-VMEM limit on every generation (v7x physical = 64 MiB),
    #     and a multi-step "parallel" axis lets v7x shard chunks across its 2 TensorCores.
    if batch_block is None:
        per_batch_bytes = DD * T * jnp.dtype(compute_dtype).itemsize
        batch_block = max(1, min(B, (8 << 20) // max(per_batch_bytes, 1)))
        while B % batch_block:                 # pick a divisor of B (no ragged blocks)
            batch_block -= 1
    grid = (B // batch_block,)

    y = pl.pallas_call(
        linear_flow_kernel,
        out_shape=jax.ShapeDtypeStruct((B, 1, T), f32),
        grid_spec=pltpu.PrefetchScalarGridSpec(
            num_scalar_prefetch=0,
            grid=grid,
            in_specs=[
                pl.BlockSpec((1, DD), lambda i: (0, 0)),                  # w (resident)
                pl.BlockSpec((1, T), lambda i: (0, 0)),                   # bias (resident)
                pl.BlockSpec((batch_block, DD, T), lambda i: (i, 0, 0)),  # x chunk
            ],
            out_specs=pl.BlockSpec((batch_block, 1, T), lambda i: (i, 0, 0)),
        ),
        compiler_params=pltpu.CompilerParams(
            dimension_semantics=("parallel",),
            vmem_limit_bytes=32 << 20,
        ),
    )(w_c, bias_f, x_c)

    return y, log_det


def init_params(D, key):
    """Deterministic __init__: QR of a random matrix, then PLU (plain JAX setup)."""
    k1, k2 = jax.random.split(key)
    a = jax.random.normal(k1, (D, D), jnp.float32)
    q, _ = jnp.linalg.qr(a)
    p, l, u = jax.scipy.linalg.lu(q)
    s = jnp.diag(u)
    s_sign = jnp.sign(s)
    log_abs_s = jnp.log(jnp.abs(s))
    # torch.empty(bias) is uninitialized -> init deterministically here.
    bias = 0.01 * jax.random.normal(k2, (D,), jnp.float32)
    return p, l, u, s_sign, log_abs_s, bias


if __name__ == "__main__":
    D = 8   # in_features
    B = 2   # batch
    key = jax.random.PRNGKey(0)
    kparam, kx = jax.random.split(key)

    p, l_tri, u_tri, s_sign, log_abs_s, bias = init_params(D, kparam)
    x = jax.random.normal(kx, (B, D * D, D), jnp.float32)

    y, log_det = linear_flow_forward(x, p, l_tri, u_tri, s_sign, log_abs_s, bias)
    jax.block_until_ready((y, log_det))

    # Pure-JAX reference of the literal PyTorch forward (float32).
    eye = jnp.eye(D, dtype=jnp.float32)
    lm = jnp.tril(jnp.ones((D, D), jnp.float32), -1)
    L = l_tri * lm + eye
    U = u_tri * lm.T + jnp.diag(s_sign * jnp.exp(log_abs_s))
    w = (p @ L @ U).reshape(1, 1, -1)
    y_ref_f32 = w @ x + bias
    ld_ref = x.shape[2] * jnp.sum(log_abs_s)

    # Reference with the same bf16 input rounding (kernel accumulates in f32 on the MXU,
    # so it should match this to accumulation-order error).
    w_b = w.astype(jnp.bfloat16).astype(jnp.float32)
    x_b = x.astype(jnp.bfloat16).astype(jnp.float32)
    y_ref_bf16 = w_b @ x_b + bias

    assert y.shape == (B, 1, D)
    assert jnp.allclose(y, y_ref_bf16, atol=2e-3, rtol=2e-3), "output mismatch (vs bf16-rounded ref)"
    assert jnp.allclose(y, y_ref_f32, atol=5e-2, rtol=5e-2), "output mismatch (vs f32 ref)"
    assert jnp.allclose(log_det, ld_ref, atol=1e-5, rtol=1e-5), "log_det mismatch"
    print("KERNEL_OK")
</pallas_src>

<mosaic_0001>
module attributes {stable_mosaic.version = 11 : i64} {
  func.func @linear_flow_kernel(%arg0: i32, %arg1: memref<1x64xbf16, #tpu.memory_space<vmem>>, %arg2: memref<1x8xf32, #tpu.memory_space<vmem>>, %arg3: memref<2x64x8xbf16, #tpu.memory_space<vmem>>, %arg4: memref<2x1x8xf32, #tpu.memory_space<vmem>>) attributes {dimension_semantics = [#tpu.dimension_semantics<parallel>], iteration_bounds = array<i64: 1>, scalar_prefetch = 0 : i64, scratch_operands = 0 : i64, tpu.core_type = #tpu.core_type<tc>, window_params = [{pipeline_mode = #tpu.pipeline_mode<synchronous>, transform_indices = @transform_0, window_bounds = array<i64: 1, 64>}, {pipeline_mode = #tpu.pipeline_mode<synchronous>, transform_indices = @transform_1, window_bounds = array<i64: 1, 8>}, {transform_indices = @transform_2, window_bounds = array<i64: 2, 64, 8>}, {transform_indices = @transform_3, window_bounds = array<i64: 2, 1, 8>}]} {
    %c0 = arith.constant 0 : index
    %c0_0 = arith.constant 0 : index
    %0 = vector.load %arg1[%c0, %c0_0] : memref<1x64xbf16, #tpu.memory_space<vmem>>, vector<1x64xbf16>
    %c0_1 = arith.constant 0 : index
    %c0_2 = arith.constant 0 : index
    %1 = vector.load %arg2[%c0_1, %c0_2] : memref<1x8xf32, #tpu.memory_space<vmem>>, vector<1x8xf32>
    %c0_3 = arith.constant 0 : index
    %c0_4 = arith.constant 0 : index
    %c0_5 = arith.constant 0 : index
    %2 = vector.load %arg3[%c0_3, %c0_4, %c0_5] : memref<2x64x8xbf16, #tpu.memory_space<vmem>>, vector<1x64x8xbf16>
    %3 = vector.shape_cast %2 : vector<1x64x8xbf16> to vector<64x8xbf16>
    %cst = arith.constant dense<0.000000e+00> : vector<1x8xf32>
    %4 = tpu.matmul %0, %3, %cst {dimension_numbers = #tpu.dot_dimension_numbers<[1], [0], [0], [1], [0, 0, 1, 1], [], []>} : vector<1x64xbf16>, vector<64x8xbf16>, vector<1x8xf32> -> vector<1x8xf32>
    %5 = arith.addf %4, %1 : vector<1x8xf32>
    %c0_6 = arith.constant 0 : index
    %c0_7 = arith.constant 0 : index
    %c0_8 = arith.constant 0 : index
    %6 = vector.load %arg4[%c0_6, %c0_7, %c0_8] : memref<2x1x8xf32, #tpu.memory_space<vmem>>, vector<1x1x8xf32>
    %7 = vector.shape_cast %6 : vector<1x1x8xf32> to vector<1x8xf32>
    %8 = vector.shape_cast %5 : vector<1x8xf32> to vector<1x1x8xf32>
    tpu.vector_store %arg4[%c0_6, %c0_7, %c0_8], %8 {strides = array<i32>} : memref<2x1x8xf32, #tpu.memory_space<vmem>>, vector<1x1x8xf32>,
    %c1 = arith.constant 1 : index
    %c0_9 = arith.constant 0 : index
    %c0_10 = arith.constant 0 : index
    %9 = vector.load %arg3[%c1, %c0_9, %c0_10] : memref<2x64x8xbf16, #tpu.memory_space<vmem>>, vector<1x64x8xbf16>
    %10 = vector.shape_cast %9 : vector<1x64x8xbf16> to vector<64x8xbf16>
    %cst_11 = arith.constant dense<0.000000e+00> : vector<1x8xf32>
    %11 = tpu.matmul %0, %10, %cst_11 {dimension_numbers = #tpu.dot_dimension_numbers<[1], [0], [0], [1], [0, 0, 1, 1], [], []>} : vector<1x64xbf16>, vector<64x8xbf16>, vector<1x8xf32> -> vector<1x8xf32>
    %12 = arith.addf %11, %1 : vector<1x8xf32>
    %c1_12 = arith.constant 1 : index
    %c0_13 = arith.constant 0 : index
    %c0_14 = arith.constant 0 : index
    %13 = vector.load %arg4[%c1_12, %c0_13, %c0_14] : memref<2x1x8xf32, #tpu.memory_space<vmem>>, vector<1x1x8xf32>
    %14 = vector.shape_cast %13 : vector<1x1x8xf32> to vector<1x8xf32>
    %15 = vector.shape_cast %12 : vector<1x8xf32> to vector<1x1x8xf32>
    tpu.vector_store %arg4[%c1_12, %c0_13, %c0_14], %15 {strides = array<i32>} : memref<2x1x8xf32, #tpu.memory_space<vmem>>, vector<1x1x8xf32>,
    return
  }
  func.func @transform_0(%arg0: i32) -> (i32, i32) {
    %c0_i32 = arith.constant 0 : i32
    %c0_i32_0 = arith.constant 0 : i32
    %c0_i32_1 = arith.constant 0 : i32
    return %c0_i32, %c0_i32_0 : i32, i32
  }
  func.func @transform_1(%arg0: i32) -> (i32, i32) {
    %c0_i32 = arith.constant 0 : i32
    %c0_i32_0 = arith.constant 0 : i32
    %c0_i32_1 = arith.constant 0 : i32
    return %c0_i32, %c0_i32_0 : i32, i32
  }
  func.func @transform_2(%arg0: i32) -> (i32, i32, i32) {
    %c0_i32 = arith.constant 0 : i32
    %c0_i32_0 = arith.constant 0 : i32
    %c0_i32_1 = arith.constant 0 : i32
    return %arg0, %c0_i32, %c0_i32_0 : i32, i32, i32
  }
  func.func @transform_3(%arg0: i32) -> (i32, i32, i32) {
    %c0_i32 = arith.constant 0 : i32
    %c0_i32_0 = arith.constant 0 : i32
    %c0_i32_1 = arith.constant 0 : i32
    return %arg0, %c0_i32, %c0_i32_0 : i32, i32, i32
  }
}

</mosaic_0001>

<bundles_post_ra>
// kernel: tpu_custom_call.1
= control target key start
LH: loop header
LB: loop body
LE: loop exit
PB: predicated region body
PF: predicated region fallthrough
CT: control target
= control target key end

     0   :  { %v274_v1 = vmov 0.0   ;;  %vm275_vm0 = vmmov 0   ;;  %s332_s0 = inlined_call_operand.vmem [shape: bf16[1,64], index: 0, kind: input, shape index: {}]   ;;  %s333_s1 = inlined_call_operand.vmem [shape: f32[1,8], index: 1, kind: input, shape index: {}]   ;;  %s334_s2 = inlined_call_operand.vmem [shape: bf16[2,64,8], index: 2, kind: input, shape index: {}]   ;;  %s335_s3 = inlined_call_operand.hbm [shape: f32[2,1,8], index: 3, kind: output, shape index: {}]  }
   0x1   :  { %v244_v0 = vld [vmem:[%s334_s2 + $0x18] sm:$0xff]   ;;  %215 = vmatprep.subr.bf16.mxu0 %v274_v1  ;;  %227 = vmatprep.subr.bf16.mxu1 %v274_v1  ;;  %v246_v3 = vld [vmem:[%s334_s2 + $0x10] sm:$0xff]   ;;  %v248_v5 = vld [vmem:[%s334_s2 + $0x8] sm:$0xff]  }
   0x2   :  { %v245_v2 = vld [vmem:[%s334_s2 + $0x38] sm:$0xff]   ;;  %216 = vmatpush3.bf16.msra.mxu0 %v244_v0  ;;  %223 = vmatprep.mubr.msk.bf16.mxu0 %vm275_vm0, %v274_v1  ;;  %v247_v4 = vld [vmem:[%s334_s2 + $0x30] sm:$0xff]   ;;  %v249_v6 = vld [vmem:[%s334_s2 + $0x28] sm:$0xff]  }
   0x3   :  { %228 = vmatpush3.bf16.msra.mxu1 %v245_v2  ;;  %217 = vmatprep.subr.bf16.mxu0 %v274_v1 }
   0x4   :  { %229 = vmatprep.subr.bf16.mxu1 %v274_v1  ;;  %235 = vmatprep.mubr.msk.bf16.mxu1 %vm275_vm0, %v274_v1 }
   0x6   :  { %218 = vmatpush3.bf16.msra.mxu0 %v246_v3 }
   0x7   :  { %230 = vmatpush3.bf16.msra.mxu1 %v247_v4  ;;  %219 = vmatprep.subr.bf16.mxu0 %v274_v1 }
   0x8   :  { %231 = vmatprep.subr.bf16.mxu1 %v274_v1 }
   0x9   :  { %8 = vsyncpa [#allocation3], 0  ;;  %v250_v7 = vld [vmem:[%s334_s2] sm:$0xff]   ;;  %vm50_vm1 = vcmask 523264   ;;  %s276_s5 = smov [#allocation2]   ;;  %vm94_vm2 = vcmask 57344  }
   0xa   :  { %220 = vmatpush3.bf16.msra.mxu0 %v248_v5  ;;  %v251_v8 = vld [vmem:[%s334_s2 + $0x20] sm:$0xff]   ;;  %s176_s6 = sshll.u32 %s276_s5, 4  ;;  %s177_s6 = int_to_ptr.vmem [resolvable:$true] %s176_s6 }
   0xb   :  { %232 = vmatpush3.bf16.msra.mxu1 %v249_v6  ;;  %221 = vmatprep.subr.bf16.mxu0 %v274_v1  ;;  %v16_v9 = vld [vmem:[%s332_s0] sm:$0x1]  ;;  %s252_s0 = scalar_lea.vmem %s177_s6, 32  ;;  %p257_p1 = scmp.lt.s32.totalorder %s177_s6, %s177_s6 }
   0xc   :  { %233 = vmatprep.subr.bf16.mxu1 %v274_v1  ;;  %v17_v10 = vld [vmem:[%s333_s1] sm:$0x1]  ;;  %p253_p0 = scmp.ne.s32.totalorder %s177_s6, %s252_s0  ;;  %p258_p2 = scmp.lt.s32.totalorder %s252_s0, %s252_s0 }
   0xe   :  { %222 = vmatpush3.bf16.msra.mxu0 %v250_v7  ;;  %p259_p3 = por %p258_p2, %p257_p1 }
   0xf   :  { %234 = vmatpush3.bf16.msra.mxu1 %v251_v8 }
  0x10   :  { %p260_p4 = pnand %p259_p3, %p253_p0 }
  0x11   :  { %224 = vmatmul.mubr.msk.bf16.vlgmr.msra.gmra.mxu0 %vm50_vm1, %v16_v9 }
  0x12   :  { %236 = vmatmul.mubr.msk.bf16.vlgmr.msra.gmra.mxu1 %vm50_vm1, %v16_v9 }
  0xd1   :  { %v88_v11 = vpop.f32.mrf.mxu0 }
  0xd2   :  { %v89_v12 = vadd.f32 %v88_v11, %v17_v10  ;;  %v163_v13 = vpop.f32.mrf.mxu1 }
  0xd3   :  { %v164_v14 = vadd.f32 %v163_v13, %v17_v10  ;;  %v225_v15 = vpop.f32.mrf.mxu0 }
  0xd4   :  { %95 = vst.msk [vmem:[#allocation2] sm:$0x1] %vm94_vm2, %v89_v12  ;;  %v237_v16 = vpop.f32.mrf.mxu1 }
  0xd5   :  { %170 = vst.msk [vmem:[#allocation2 + $0x1] sm:$0x1] %vm94_vm2, %v164_v14  ;;  %v91_v17 = vpop.f32.mrf.mxu0 }
  0xd6   :  { %v166_v18 = vpop.f32.mrf.mxu1 }
  0xd7   :  { %263 = shalt.err (!%p260_p4)
}
  0xd8   :  { %s277_s1 = smov 16   ;;  %s278_s2 = smov 1   ;;  %v226_v19 = vpop.f32.mrf.mxu0  ;;  %v238_v20 = vpop.f32.mrf.mxu1 }
  0xd9   :  { %182 = dma.vmem_to_hbm [thread:$0]  %s177_s6, 32, %s335_s3, [#allocation3], %s277_s1, %s277_s1, %s278_s2  }
  0xda   :  { %272 = dma.done.wait [#allocation3], 32  }
  0xdb   :  { %273 = vsyncadd [#allocation3], 4294967264 }
  0xdc   :  { %186 = vsyncpa [#allocation3], 1 }

</bundles_post_ra>
